<compile_context>
chip_gen: v7x
topology: tpu7x:2x2x1
jax: 0.10.0
libtpu: 0.0.40
codegen_flags: <defaults>
</compile_context>

<pallas_src>
import jax
import jax.numpy as jnp
import numpy as np
from jax.experimental import pallas as pl
from jax.experimental.pallas import tpu as pltpu


# ----------------------------------------------------------------------------
# Kernel builder
# ----------------------------------------------------------------------------
def make_brain_mlp_kernel(num_agg_layers):
    """Fused kernel for a fixed architecture.

    Ref order:
      x_ref,
      agg W0, agg b0, agg W1, agg b1, ...,
      folded-head W, folded-head b,
      out_ref                                 (single concatenated slab)
    """
    n_agg = 2 * num_agg_layers

    def kernel(*refs):
        x_ref = refs[0]
        agg_refs = refs[1: 1 + n_agg]
        hw_ref = refs[1 + n_agg]
        hb_ref = refs[2 + n_agg]
        out_ref = refs[3 + n_agg]

        # --- feature aggregator: Linear + Swish per layer (LinearEncoder) ---
        h = x_ref[...]
        for l in range(num_agg_layers):
            w = agg_refs[2 * l][...]
            b = agg_refs[2 * l + 1][...]
            h = jnp.dot(h, w, preferred_element_type=jnp.float32) + b
            h = h * jax.nn.sigmoid(h)  # Swish: x * sigmoid(x) (EUP + VPU)

        # --- all feature selectors folded into a single affine map ----------
        g = jnp.dot(h, hw_ref[...], preferred_element_type=jnp.float32)
        g = g + hb_ref[...]

        out_ref[...] = g.astype(out_ref.dtype)

    return kernel


def _round_up(x, m):
    return ((x + m - 1) // m) * m


def _cdiv(a, b):
    return -(-a // b)


def _default_min_grid_steps():
    # v7x has 2 TensorCores per chip -> keep >= 2 grid steps when the batch
    # allows; v5e/v6e have a single TC, so extra steps are pure loop overhead.
    try:
        kind = jax.devices()[0].device_kind.lower()
        if "v7" in kind or "7x" in kind:
            return 2
    except Exception:
        pass
    return 1


# ----------------------------------------------------------------------------
# Wrapper
# ----------------------------------------------------------------------------
def brain_mlp_forward(x, agg_params, head_params, output_channels,
                      tb_cap=2048, min_grid_steps=None):
    """Run the fused BrainMLP kernel.

    x:            [B, input_size] float32
    agg_params:   list of (W [in, out], b [1, out]) for the aggregator
    head_params:  list (per head) of lists of (W, b); all heads same depth
    returns:      list of [B, ch_i, size_i] arrays
    """
    B, in_dim = x.shape
    depth = len(head_params[0])
    assert all(len(h) == depth for h in head_params), "heads must share depth"
    if min_grid_steps is None:
        min_grid_steps = _default_min_grid_steps()

    # ---- fold each activation-free head chain into one affine map ----------
    # (pure param prep, done once in JAX; f32 accumulation order changes by
    #  ~1e-6 vs per-layer application at these widths)
    folded_w, folded_b, final_dims = [], [], []
    for head in head_params:
        W, b = head[0]
        for l in range(1, depth):
            Wl, bl = head[l]
            W = W @ Wl
            b = b @ Wl + bl
        folded_w.append(W)
        folded_b.append(b)
        final_dims.append(W.shape[1])

    head_w = jnp.concatenate(folded_w, axis=1)     # [hidden, sum(final_dims)]
    head_b = jnp.concatenate(folded_b, axis=1)     # [1,      sum(final_dims)]
    total_out = sum(final_dims)

    # pad the folded head output width to a multiple of 128 lanes so the
    # output store is a full, unmasked vst (lane-dense out_spec lever)
    out_pad = (-total_out) % 128
    if out_pad:
        head_w = jnp.pad(head_w, ((0, 0), (0, out_pad)))
        head_b = jnp.pad(head_b, ((0, 0), (0, out_pad)))
    padded_out = total_out + out_pad

    # ---- batch tiling: balanced, 8-aligned tiles ----------------------------
    B_pad = _round_up(B, 8)                         # f32 sublane tile
    num_tiles = _cdiv(B_pad, tb_cap)
    if B_pad >= 16 * min_grid_steps:                # only split if worth it
        num_tiles = max(num_tiles, min_grid_steps)
    TB = _round_up(_cdiv(B_pad, num_tiles), 8)      # balanced tile, <= 7+ rows waste
    num_tiles = _cdiv(B_pad, TB)
    B_padded = num_tiles * TB
    if B_padded != B:
        x = jnp.pad(x, ((0, B_padded - B), (0, 0)))
    grid = (num_tiles,)

    # ---- flatten params & specs --------------------------------------------
    flat_params = []
    for (w, b) in agg_params:
        flat_params += [w, b]
    flat_params += [head_w, head_b]

    in_specs = [pl.BlockSpec((TB, in_dim), lambda i: (i, 0))]
    # parameters: full-array blocks, grid-invariant index_map (block (0,0))
    in_specs += [pl.BlockSpec(p.shape, lambda i: (0, 0)) for p in flat_params]

    out_shape = jax.ShapeDtypeStruct((B_padded, padded_out), jnp.float32)
    out_specs = pl.BlockSpec((TB, padded_out), lambda i: (i, 0))

    # advisory cost estimate so XLA schedules the tiny custom call well
    hidden = agg_params[0][0].shape[1]
    n_agg = len(agg_params)
    flops = 2 * B_padded * (in_dim * hidden
                            + (n_agg - 1) * hidden * hidden
                            + hidden * padded_out)
    transcendentals = B_padded * hidden * n_agg
    bytes_accessed = 4 * (B_padded * in_dim + B_padded * padded_out
                          + sum(int(np.prod(p.shape)) for p in flat_params))

    kernel = make_brain_mlp_kernel(n_agg)

    out = pl.pallas_call(
        kernel,
        grid=grid,
        in_specs=in_specs,
        out_specs=out_specs,
        out_shape=out_shape,
        compiler_params=pltpu.CompilerParams(
            dimension_semantics=("parallel",),
        ),
        cost_estimate=pl.CostEstimate(
            flops=flops,
            transcendentals=transcendentals,
            bytes_accessed=bytes_accessed,
        ),
    )(x, *flat_params)

    # ---- glue: slice padding off, split per head, .view(B, ch, -1) ---------
    out = out[:B, :total_out]
    results, c = [], 0
    for d, ch in zip(final_dims, output_channels):
        results.append(out[:, c:c + d].reshape(B, ch, -1))
        c += d
    return results


# ----------------------------------------------------------------------------
# Pure-JAX reference (for correctness check)
# ----------------------------------------------------------------------------
def ref_forward(x, agg_params, head_params, output_channels):
    h = x
    for w, b in agg_params:
        h = h @ w + b
        h = h * jax.nn.sigmoid(h)
    outs = []
    for head, ch in zip(head_params, output_channels):
        g = h
        for w, b in head:
            g = g @ w + b
        outs.append(g.reshape(g.shape[0], ch, -1))
    return outs


# ----------------------------------------------------------------------------
# Deterministic parameter init (matches nn.Linear default ranges)
# ----------------------------------------------------------------------------
def init_linear(key, fan_in, fan_out):
    kw, kb = jax.random.split(key)
    scale = 1.0 / np.sqrt(fan_in)
    w = jax.random.uniform(kw, (fan_in, fan_out), jnp.float32, -scale, scale)
    b = jax.random.uniform(kb, (1, fan_out), jnp.float32, -scale, scale)
    return w, b


if __name__ == "__main__":
    # Module hyperparameters (small, consistent with the forward pass)
    input_size = 24
    aggregation_layers = 2
    hidden_size = 32
    feature_selection_layers = 2
    output_sizes = [8, 6]
    output_channels = [2, 3]
    batch = 8

    key = jax.random.PRNGKey(0)
    key, kx = jax.random.split(key)
    x = jax.random.normal(kx, (batch, input_size), jnp.float32)

    # feature_aggregator = LinearEncoder(input_size, aggregation_layers, hidden)
    agg_params = []
    fan_in = input_size
    for _ in range(aggregation_layers):
        key, k = jax.random.split(key)
        agg_params.append(init_linear(k, fan_in, hidden_size))
        fan_in = hidden_size

    # feature_selectors: (feature_selection_layers - 1) hidden linears + final
    head_params = []
    for shape, ch in zip(output_sizes, output_channels):
        head = []
        for _ in range(feature_selection_layers - 1):
            key, k = jax.random.split(key)
            head.append(init_linear(k, hidden_size, hidden_size))
        key, k = jax.random.split(key)
        head.append(init_linear(k, hidden_size, shape * ch))
        head_params.append(head)

    # TODO(synk): version_number buffer is a non-grad parameter unused in
    # forward(); nothing to port into the kernel.
    version_number = jnp.array([3.0], jnp.float32)  # MODEL_EXPORT_VERSION

    outs = brain_mlp_forward(x, agg_params, head_params, output_channels)
    outs = [jax.block_until_ready(o) for o in outs]

    refs = ref_forward(x, agg_params, head_params, output_channels)
    for o, r, ch, sz in zip(outs, refs, output_channels, output_sizes):
        assert o.shape == (batch, ch, sz), (o.shape, (batch, ch, sz))
        np.testing.assert_allclose(np.asarray(o), np.asarray(r),
                                   rtol=1e-5, atol=1e-5)

    print("KERNEL_OK")
</pallas_src>

<mosaic_0001>
module attributes {stable_mosaic.version = 11 : i64} {
  func.func @kernel(%arg0: i32, %arg1: memref<8x24xf32, #tpu.memory_space<vmem>>, %arg2: memref<24x32xf32, #tpu.memory_space<vmem>>, %arg3: memref<1x32xf32, #tpu.memory_space<vmem>>, %arg4: memref<32x32xf32, #tpu.memory_space<vmem>>, %arg5: memref<1x32xf32, #tpu.memory_space<vmem>>, %arg6: memref<32x128xf32, #tpu.memory_space<vmem>>, %arg7: memref<1x128xf32, #tpu.memory_space<vmem>>, %arg8: memref<8x128xf32, #tpu.memory_space<vmem>>) attributes {dimension_semantics = [#tpu.dimension_semantics<parallel>], iteration_bounds = array<i64: 1>, scalar_prefetch = 0 : i64, scratch_operands = 0 : i64, tpu.core_type = #tpu.core_type<tc>, window_params = [{transform_indices = @transform_0, window_bounds = array<i64: 8, 24>}, {pipeline_mode = #tpu.pipeline_mode<synchronous>, transform_indices = @transform_1, window_bounds = array<i64: 24, 32>}, {pipeline_mode = #tpu.pipeline_mode<synchronous>, transform_indices = @transform_2, window_bounds = array<i64: 1, 32>}, {pipeline_mode = #tpu.pipeline_mode<synchronous>, transform_indices = @transform_3, window_bounds = array<i64: 32, 32>}, {pipeline_mode = #tpu.pipeline_mode<synchronous>, transform_indices = @transform_4, window_bounds = array<i64: 1, 32>}, {pipeline_mode = #tpu.pipeline_mode<synchronous>, transform_indices = @transform_5, window_bounds = array<i64: 32, 128>}, {pipeline_mode = #tpu.pipeline_mode<synchronous>, transform_indices = @transform_6, window_bounds = array<i64: 1, 128>}, {transform_indices = @transform_7, window_bounds = array<i64: 8, 128>}]} {
    %c0 = arith.constant 0 : index
    %c0_0 = arith.constant 0 : index
    %0 = vector.load %arg1[%c0, %c0_0] : memref<8x24xf32, #tpu.memory_space<vmem>>, vector<8x24xf32>
    %c0_1 = arith.constant 0 : index
    %c0_2 = arith.constant 0 : index
    %1 = vector.load %arg2[%c0_1, %c0_2] : memref<24x32xf32, #tpu.memory_space<vmem>>, vector<24x32xf32>
    %c0_3 = arith.constant 0 : index
    %c0_4 = arith.constant 0 : index
    %2 = vector.load %arg3[%c0_3, %c0_4] : memref<1x32xf32, #tpu.memory_space<vmem>>, vector<1x32xf32>
    %cst = arith.constant dense<0.000000e+00> : vector<8x32xf32>
    %3 = tpu.matmul %0, %1, %cst {dimension_numbers = #tpu.dot_dimension_numbers<[1], [0], [0], [1], [0, 0, 1, 1], [], []>} : vector<8x24xf32>, vector<24x32xf32>, vector<8x32xf32> -> vector<8x32xf32>
    %4 = vector.broadcast %2 : vector<1x32xf32> to vector<8x32xf32>
    %5 = arith.addf %3, %4 : vector<8x32xf32>
    %6 = arith.negf %5 : vector<8x32xf32>
    %7 = math.exp %6 : vector<8x32xf32>
    %cst_5 = arith.constant 1.000000e+00 : f32
    %8 = vector.broadcast %cst_5 : f32 to vector<8x32xf32>
    %9 = arith.addf %8, %7 : vector<8x32xf32>
    %10 = arith.divf %8, %9 : vector<8x32xf32>
    %11 = arith.mulf %5, %10 : vector<8x32xf32>
    %c0_6 = arith.constant 0 : index
    %c0_7 = arith.constant 0 : index
    %12 = vector.load %arg4[%c0_6, %c0_7] : memref<32x32xf32, #tpu.memory_space<vmem>>, vector<32x32xf32>
    %c0_8 = arith.constant 0 : index
    %c0_9 = arith.constant 0 : index
    %13 = vector.load %arg5[%c0_8, %c0_9] : memref<1x32xf32, #tpu.memory_space<vmem>>, vector<1x32xf32>
    %cst_10 = arith.constant dense<0.000000e+00> : vector<8x32xf32>
    %14 = tpu.matmul %11, %12, %cst_10 {dimension_numbers = #tpu.dot_dimension_numbers<[1], [0], [0], [1], [0, 0, 1, 1], [], []>} : vector<8x32xf32>, vector<32x32xf32>, vector<8x32xf32> -> vector<8x32xf32>
    %15 = vector.broadcast %13 : vector<1x32xf32> to vector<8x32xf32>
    %16 = arith.addf %14, %15 : vector<8x32xf32>
    %17 = arith.negf %16 : vector<8x32xf32>
    %18 = math.exp %17 : vector<8x32xf32>
    %cst_11 = arith.constant 1.000000e+00 : f32
    %19 = vector.broadcast %cst_11 : f32 to vector<8x32xf32>
    %20 = arith.addf %19, %18 : vector<8x32xf32>
    %21 = arith.divf %19, %20 : vector<8x32xf32>
    %22 = arith.mulf %16, %21 : vector<8x32xf32>
    %c0_12 = arith.constant 0 : index
    %c0_13 = arith.constant 0 : index
    %23 = vector.load %arg6[%c0_12, %c0_13] : memref<32x128xf32, #tpu.memory_space<vmem>>, vector<32x128xf32>
    %cst_14 = arith.constant dense<0.000000e+00> : vector<8x128xf32>
    %24 = tpu.matmul %22, %23, %cst_14 {dimension_numbers = #tpu.dot_dimension_numbers<[1], [0], [0], [1], [0, 0, 1, 1], [], []>} : vector<8x32xf32>, vector<32x128xf32>, vector<8x128xf32> -> vector<8x128xf32>
    %c0_15 = arith.constant 0 : index
    %c0_16 = arith.constant 0 : index
    %25 = vector.load %arg7[%c0_15, %c0_16] : memref<1x128xf32, #tpu.memory_space<vmem>>, vector<1x128xf32>
    %26 = vector.broadcast %25 : vector<1x128xf32> to vector<8x128xf32>
    %27 = arith.addf %24, %26 : vector<8x128xf32>
    %c0_17 = arith.constant 0 : index
    %c0_18 = arith.constant 0 : index
    %28 = vector.load %arg8[%c0_17, %c0_18] : memref<8x128xf32, #tpu.memory_space<vmem>>, vector<8x128xf32>
    tpu.vector_store %arg8[%c0_17, %c0_18], %27 {strides = array<i32>} : memref<8x128xf32, #tpu.memory_space<vmem>>, vector<8x128xf32>,
    return
  }
  func.func @transform_0(%arg0: i32) -> (i32, i32) {
    %c0_i32 = arith.constant 0 : i32
    %c0_i32_0 = arith.constant 0 : i32
    return %arg0, %c0_i32 : i32, i32
  }
  func.func @transform_1(%arg0: i32) -> (i32, i32) {
    %c0_i32 = arith.constant 0 : i32
    %c0_i32_0 = arith.constant 0 : i32
    %c0_i32_1 = arith.constant 0 : i32
    return %c0_i32, %c0_i32_0 : i32, i32
  }
  func.func @transform_2(%arg0: i32) -> (i32, i32) {
    %c0_i32 = arith.constant 0 : i32
    %c0_i32_0 = arith.constant 0 : i32
    %c0_i32_1 = arith.constant 0 : i32
    return %c0_i32, %c0_i32_0 : i32, i32
  }
  func.func @transform_3(%arg0: i32) -> (i32, i32) {
    %c0_i32 = arith.constant 0 : i32
    %c0_i32_0 = arith.constant 0 : i32
    %c0_i32_1 = arith.constant 0 : i32
    return %c0_i32, %c0_i32_0 : i32, i32
  }
  func.func @transform_4(%arg0: i32) -> (i32, i32) {
    %c0_i32 = arith.constant 0 : i32
    %c0_i32_0 = arith.constant 0 : i32
    %c0_i32_1 = arith.constant 0 : i32
    return %c0_i32, %c0_i32_0 : i32, i32
  }
  func.func @transform_5(%arg0: i32) -> (i32, i32) {
    %c0_i32 = arith.constant 0 : i32
    %c0_i32_0 = arith.constant 0 : i32
    %c0_i32_1 = arith.constant 0 : i32
    return %c0_i32, %c0_i32_0 : i32, i32
  }
  func.func @transform_6(%arg0: i32) -> (i32, i32) {
    %c0_i32 = arith.constant 0 : i32
    %c0_i32_0 = arith.constant 0 : i32
    %c0_i32_1 = arith.constant 0 : i32
    return %c0_i32, %c0_i32_0 : i32, i32
  }
  func.func @transform_7(%arg0: i32) -> (i32, i32) {
    %c0_i32 = arith.constant 0 : i32
    %c0_i32_0 = arith.constant 0 : i32
    return %arg0, %c0_i32 : i32, i32
  }
}

</mosaic_0001>

<bundles_post_ra>
// kernel: tpu_custom_call.1
= control target key start
LH: loop header
LB: loop body
LE: loop exit
PB: predicated region body
PF: predicated region fallthrough
CT: control target
= control target key end

     0   :  { %12 = vsyncpa [#allocation3], 0  ;;  %s703_s0 = inlined_call_operand.hbm [shape: f32[8,24], index: 0, kind: input, shape index: {}]   ;;  %s704_s1 = inlined_call_operand.hbm [shape: f32[24,32], index: 1, kind: input, shape index: {}]   ;;  %s705_s2 = inlined_call_operand.vmem [shape: f32[1,32], index: 2, kind: input, shape index: {}]   ;;  %s706_s3 = inlined_call_operand.hbm [shape: f32[32,32], index: 3, kind: input, shape index: {}]   ;;  %s707_s4 = inlined_call_operand.vmem [shape: f32[1,32], index: 4, kind: input, shape index: {}]   ;;  %s708_s5 = inlined_call_operand.hbm [shape: f32[32,128], index: 5, kind: input, shape index: {}]   ;;  %s709_s6 = inlined_call_operand.vmem [shape: f32[1,128], index: 6, kind: input, shape index: {}]   ;;  %s710_s7 = inlined_call_operand.hbm [shape: f32[8,128], index: 7, kind: output, shape index: {}]  }
   0x1   :  { %13 = vsyncpa [#allocation6], 0 }
   0x2   :  { %14 = vsyncpa [#allocation9], 0 }
   0x3   :  { %15 = vsyncpa [#allocation4], 0  ;;  %s570_s24 = smov [#allocation5]   ;;  %s452_s28 = scalar_lea.hbm %s704_s1, 384 }
   0x4   :  { %s31_s25 = sshll.u32 %s570_s24, 4  ;;  %p453_p0 = scmp.ne.s32.totalorder %s704_s1, %s452_s28  ;;  %s32_s25 = int_to_ptr.vmem [resolvable:$true] %s31_s25 }
   0x5   :  { %p456_p1 = scmp.lt.u32.totalorder %s452_s28, %s704_s1 }
   0x7   :  { %p458_p2 = pnand %p456_p1, %p453_p0 }
   0x9   :  { %461 = shalt.err (!%p458_p2)
}
   0xa   :  { %s462_s10 = scalar_lea.vmem %s32_s25, 384  ;;  %p467_p4 = scmp.lt.s32.totalorder %s32_s25, %s32_s25 }
   0xb   :  { %p463_p3 = scmp.ne.s32.totalorder %s32_s25, %s462_s10  ;;  %p468_p5 = scmp.lt.s32.totalorder %s462_s10, %s462_s10 }
   0xd   :  { %p469_p6 = por %p468_p5, %p467_p4 }
   0xf   :  { %p470_p7 = pnand %p469_p6, %p463_p3 }
  0x11   :  { %473 = shalt.err (!%p470_p7)
}
  0x12   :  { %s571_s11 = smov 128   ;;  %s572_s12 = smov 8  }
  0x13   :  { %37 = dma.hbm_to_vmem [thread:$0]  %s704_s1, 384, %s32_s25, [#allocation6], %s571_s11, %s571_s11, %s572_s12  }
  0x14   :  { %s573_s15 = smov [#allocation2]   ;;  %s574_s17 = smov [#allocation7]  }
  0x15   :  { %s22_s16 = sshll.u32 %s573_s15, 4  ;;  %s45_s18 = sshll.u32 %s574_s17, 4  ;;  %s23_s16 = int_to_ptr.vmem [resolvable:$true] %s22_s16  ;;  %s46_s18 = int_to_ptr.vmem [resolvable:$true] %s45_s18 }
  0x16   :  { %s474_s21 = scalar_lea.hbm %s703_s0, 128 }
  0x17   :  { %p475_p8 = scmp.ne.s32.totalorder %s703_s0, %s474_s21  ;;  %p478_p9 = scmp.lt.u32.totalorder %s474_s21, %s703_s0 }
  0x19   :  { %p480_p10 = pnand %p478_p9, %p475_p8 }
  0x1b   :  { %483 = shalt.err (!%p480_p10)
}
  0x1c   :  { %s484_s1 = scalar_lea.vmem %s23_s16, 128  ;;  %p489_p12 = scmp.lt.s32.totalorder %s23_s16, %s23_s16 }
  0x1d   :  { %p485_p11 = scmp.ne.s32.totalorder %s23_s16, %s484_s1  ;;  %p490_p13 = scmp.lt.s32.totalorder %s484_s1, %s484_s1 }
  0x1f   :  { %p491_p0 = por %p490_p13, %p489_p12 }
  0x21   :  { %p492_p1 = pnand %p491_p0, %p485_p11 }
  0x23   :  { %495 = shalt.err (!%p492_p1)
}
  0x24   :  { %25 = dma.hbm_to_vmem [thread:$0]  %s703_s0, 128, %s23_s16, [#allocation3]  }
  0x25   :  { %s496_s30 = scalar_lea.hbm %s706_s3, 512 }
  0x26   :  { %p497_p2 = scmp.ne.s32.totalorder %s706_s3, %s496_s30  ;;  %p500_p3 = scmp.lt.u32.totalorder %s496_s30, %s706_s3 }
  0x28   :  { %p502_p4 = pnand %p500_p3, %p497_p2 }
  0x2a   :  { %505 = shalt.err (!%p502_p4)
}
  0x2b   :  { %s506_s14 = scalar_lea.vmem %s46_s18, 512  ;;  %p511_p6 = scmp.lt.s32.totalorder %s46_s18, %s46_s18 }
  0x2c   :  { %p507_p5 = scmp.ne.s32.totalorder %s46_s18, %s506_s14  ;;  %p512_p7 = scmp.lt.s32.totalorder %s506_s14, %s506_s14 }
  0x2e   :  { %p513_p8 = por %p512_p7, %p511_p6 }
  0x30   :  { %p514_p9 = pnand %p513_p8, %p507_p5 }
  0x32   :  { %517 = shalt.err (!%p514_p9)
}
  0x33   :  { %51 = dma.hbm_to_vmem [thread:$0]  %s706_s3, 512, %s46_s18, [#allocation6], %s571_s11, %s571_s11, %s572_s12  }
  0x34   :  { %s575_s16 = smov [#allocation8]   ;;  %s518_s21 = scalar_lea.hbm %s708_s5, 512 }
  0x35   :  { %s59_s17 = sshll.u32 %s575_s16, 4  ;;  %p519_p10 = scmp.ne.s32.totalorder %s708_s5, %s518_s21  ;;  %s60_s17 = int_to_ptr.vmem [resolvable:$true] %s59_s17 }
  0x36   :  { %p522_p11 = scmp.lt.u32.totalorder %s518_s21, %s708_s5 }
  0x38   :  { %p524_p12 = pnand %p522_p11, %p519_p10 }
  0x3a   :  { %527 = shalt.err (!%p524_p12)
}
  0x3b   :  { %s528_s1 = scalar_lea.vmem %s60_s17, 512  ;;  %p533_p0 = scmp.lt.s32.totalorder %s60_s17, %s60_s17 }
  0x3c   :  { %p529_p13 = scmp.ne.s32.totalorder %s60_s17, %s528_s1  ;;  %p534_p1 = scmp.lt.s32.totalorder %s528_s1, %s528_s1 }
  0x3e   :  { %p535_p2 = por %p534_p1, %p533_p0 }
  0x40   :  { %p536_p3 = pnand %p535_p2, %p529_p13 }
  0x42   :  { %539 = shalt.err (!%p536_p3)
}
  0x43   :  { %65 = dma.hbm_to_vmem [thread:$0]  %s708_s5, 512, %s60_s17, [#allocation9], %s571_s11, %s571_s11, %s572_s12  }
  0x44   :  { %562 = dma.done.wait [#allocation3], 128  }
  0x45   :  { %563 = vsyncadd [#allocation3], 4294967168 }
  0x46   :  { %564 = dma.done.wait [#allocation6], 896  }
  0x47   :  { %565 = vsyncadd [#allocation6], 4294966400 }
  0x48   :  { %566 = dma.done.wait [#allocation9], 512  }
  0x49   :  { %567 = vsyncadd [#allocation9], 4294966784  ;;  %v576_v0 = vmov 0.0|0.0   ;;  %vm577_vm0 = vmmov 0   ;;  %v578_v1 = vmov 0.0   ;;  %v81_v2 = vld [vmem:[#allocation5] sm:$0xff] }
  0x4a   :  { %419 = vmatprep.subr.bf16.mxu0 %v576_v0  ;;  %394 = vmatprep.mubr.msk.f32.mxu0 %vm577_vm0, %v578_v1  ;;  %v82_v3 = vld [vmem:[#allocation5 + $0x8] sm:$0xff]  ;;  %v83_v5 = vld [vmem:[#allocation5 + $0x10] sm:$0xff]  ;;  %v80_v6 = vld [vmem:[#allocation2] sm:$0xff]  ;;  %vm91_vm1 = vcmask 195584   ;;  %vm183_vm2 = vcmask 261120   ;;  %s579_s28 = smov [#allocation10]  }
  0x4b   :  { %422 = vmatprep.subr.bf16.mxu1 %v576_v0  ;;  %405 = vmatprep.mubr.msk.f32.mxu1 %vm577_vm0, %v578_v1  ;;  %v420_v4 = vpack.c.bf16 %v82_v3, %v81_v2  ;;  %v172_v7 = vld [vmem:[#allocation7] sm:$0xff]  ;;  %v173_v8 = vld [vmem:[#allocation7 + $0x8] sm:$0xff]  ;;  %v174_v10 = vld [vmem:[#allocation7 + $0x10] sm:$0xff]  ;;  %s355_s29 = sshll.u32 %s579_s28, 4  ;;  %s356_s29 = int_to_ptr.vmem [resolvable:$true] %s355_s29 }
  0x4c   :  { %v423_v9 = vpack.c.bf16 %v173_v8, %v172_v7  ;;  %v175_v11 = vld [vmem:[#allocation7 + $0x18] sm:$0xff]  ;;  %v366_v13 = vld [vmem:[%s705_s2] ss:$0 sm:$0xff]  ;;  %v265_v23 = vld [vmem:[#allocation8 + $0x8] sm:$0xff]  ;;  %p545_p5 = scmp.lt.s32.totalorder %s356_s29, %s356_s29 }
  0x4d   :  { %421 = vmatpush3.bf16.msra.mxu0 %v420_v4  ;;  %v426_v12 = vpack.c.bf16 %v175_v11, %v174_v10  ;;  %v264_v22 = vld [vmem:[#allocation8] sm:$0xff]  ;;  %v266_v25 = vld [vmem:[#allocation8 + $0x10] sm:$0xff]  ;;  %v267_v26 = vld [vmem:[#allocation8 + $0x18] sm:$0xff] }
  0x4e   :  { %392 = vmatprep.subr.mxu0 %v578_v1  ;;  %424 = vmatpush3.bf16.msra.mxu1 %v423_v9  ;;  %v429_v24 = vpack.c.bf16 %v265_v23, %v264_v22  ;;  %v432_v27 = vpack.c.bf16 %v267_v26, %v266_v25  ;;  %v369_v28 = vld [vmem:[%s707_s4] ss:$0 sm:$0xff]  ;;  %s540_s4 = scalar_lea.vmem %s356_s29, 128 }
  0x4f   :  { %425 = vmatprep.subr.bf16.mxu1 %v576_v0  ;;  %v372_v37 = vld [vmem:[%s709_s6] ss:$0 sm:$0xff]  ;;  %p541_p4 = scmp.ne.s32.totalorder %s356_s29, %s540_s4  ;;  %p546_p6 = scmp.lt.s32.totalorder %s540_s4, %s540_s4 }
  0x51   :  { %393 = vmatpush3.msra.mxu0 %v83_v5  ;;  %p547_p7 = por %p546_p6, %p545_p5 }
  0x52   :  { %395 = vmatmul.mubr.msk.f32.vlgmr.msra.gmra.mrb[0].mxu0 %vm91_vm1, %v80_v6  ;;  %428 = vmatprep.subr.bf16.mxu0 %v576_v0 }
  0x53   :  { %416 = vmatprep.mubr.msk.f32.mxu0 %vm577_vm0, %v578_v1  ;;  %427 = vmatpush3.bf16.msra.mxu1 %v426_v12  ;;  %p548_p8 = pnand %p547_p7, %p541_p4 }
  0x54   :  { %430 = vmatpush3.bf16.msra.mxu0 %v429_v24 }
  0x55   :  { %431 = vmatprep.subr.bf16.mxu0 %v576_v0 }
  0x58   :  { %433 = vmatpush3.bf16.msra.mxu0 %v432_v27 }
 0x125   :  { %v161_v14 = vpop.f32.mrb[0].mxu0 }
 0x126   :  { %v162_v15 = vadd.f32 %v366_v13, %v161_v14  ;;  %v396_v16 = vpop.f32.mrb[1].mxu0 }
 0x128   :  { %v368_v17 = vmul.f32 -1.442695, %v162_v15 }
 0x12a   :  { %444 = vpow2.f32 %v368_v17 }
 0x134   :  { %v445_v18 = vpop.eup %444 }
 0x135   :  { %v168_v19 = vadd.f32 1.0, %v445_v18 }
 0x137   :  { %446 = vrcp.f32 %v168_v19 }
 0x141   :  { %v447_v20 = vpop.eup %446 }
 0x142   :  { %v171_v21 = vmul.f32 %v447_v20, %v162_v15 }
 0x144   :  { %406 = vmatmul.mubr.msk.f32.vlgmr.msra.gmra.mrb[0].mxu1 %vm183_vm2, %v171_v21 }
 0x217   :  { %v253_v29 = vpop.f32.mrb[0].mxu1 }
 0x218   :  { %v254_v30 = vadd.f32 %v369_v28, %v253_v29  ;;  %v407_v31 = vpop.f32.mrb[1].mxu1 }
 0x21a   :  { %v371_v32 = vmul.f32 -1.442695, %v254_v30 }
 0x21c   :  { %448 = vpow2.f32 %v371_v32 }
 0x226   :  { %v449_v33 = vpop.eup %448 }
 0x227   :  { %v260_v34 = vadd.f32 1.0, %v449_v33 }
 0x229   :  { %450 = vrcp.f32 %v260_v34 }
 0x233   :  { %v451_v35 = vpop.eup %450 }
 0x234   :  { %v263_v36 = vmul.f32 %v451_v35, %v254_v30 }
 0x236   :  { %417 = vmatmul.mubr.msk.f32.vlgmr.msra.gmra.mrb[2].mxu0 %vm183_vm2, %v263_v36 }
 0x309   :  { %v344_v38 = vpop.f32.mrb[2].mxu0 }
 0x30a   :  { %v345_v39 = vadd.f32 %v372_v37, %v344_v38  ;;  %v418_v40 = vpop.f32.mrb[3].mxu0 }
 0x30c   :  { %348 = vst [vmem:[#allocation10] sm:$0xff] %v345_v39 }
 0x30d   :  { %551 = shalt.err (!%p548_p8)
}
 0x30e   :  { %s552_s9 = scalar_lea.hbm %s710_s7, 128 }
 0x30f   :  { %p553_p9 = scmp.ne.s32.totalorder %s710_s7, %s552_s9  ;;  %p556_p10 = scmp.lt.u32.totalorder %s552_s9, %s710_s7 }
 0x311   :  { %p558_p11 = pnand %p556_p10, %p553_p9 }
 0x313   :  { %561 = shalt.err (!%p558_p11)
}
 0x314   :  { %358 = dma.vmem_to_hbm [thread:$0]  %s356_s29, 128, %s710_s7, [#allocation4]  }
 0x315   :  { %568 = dma.done.wait [#allocation4], 128  }
 0x316   :  { %569 = vsyncadd [#allocation4], 4294967168 }
 0x317   :  { %362 = vsyncpa [#allocation3], 1 }
 0x318   :  { %363 = vsyncpa [#allocation6], 1 }
 0x319   :  { %364 = vsyncpa [#allocation9], 1 }
 0x31a   :  { %365 = vsyncpa [#allocation4], 1 }

</bundles_post_ra>
